<compile_context>
chip_gen: v7x
topology: tpu7x:2x2x1
jax: 0.10.0
libtpu: 0.0.40
codegen_flags: <defaults>
</compile_context>

<pallas_src>
import functools

import jax
import jax.numpy as jnp
from jax.experimental import pallas as pl
from jax.experimental.pallas import tpu as pltpu


def _pick_tile(n, cap, step):
    """Largest divisor of n that is <= cap and a multiple of `step`; else n."""
    if n <= cap:
        return n
    t = (cap // step) * step
    while t >= step:
        if n % t == 0:
            return t
        t -= step
    return n


# ------------------------------------------------------------------
# Kernel 1: TokenConv + residual + LayerNorm + score Linear + exp, fused.
# ------------------------------------------------------------------
def _ctm_head_kernel(x_ref, halo_ref, w_ref, p_ref, sb_ref,
                     xn_ref, misc_ref, *, tn, c, fuse_taps):
    x = x_ref[0].astype(jnp.float32)                    # (TN, C)
    halo = halo_ref[0, 0].astype(jnp.float32)           # (2, C), zeroed at ends
    prev_row = halo[0:1, :]                             # x[i*TN - 1]  (or 0)
    next_row = halo[1:2, :]                             # x[(i+1)*TN]  (or 0)

    # Row-shifted slabs for the 3-tap conv.  pltpu.roll requires a
    # non-negative shift, so the +1 token shift is a rotation by tn-1.
    row = jax.lax.broadcasted_iota(jnp.int32, (tn, 1), 0)
    x_m1 = jnp.where(row == 0, prev_row, pltpu.roll(x, shift=1, axis=0))
    x_p1 = jnp.where(row == tn - 1, next_row, pltpu.roll(x, shift=tn - 1, axis=0))

    if fuse_taps:
        # Single (TN,3C)x(3C,Co) bf16 MXU matmul, f32 accumulation.  The lane
        # concat is 128-aligned (C % 128 == 0), cast to bf16 once afterwards.
        x_cat = jnp.concatenate([x_m1, x, x_p1], axis=-1).astype(jnp.bfloat16)
        conv = jnp.dot(x_cat, w_ref[...], preferred_element_type=jnp.float32)
    else:
        # Fallback for C not 128-aligned: three K=C matmuls.
        conv = jnp.dot(x_m1.astype(jnp.bfloat16), w_ref[0:c, :],
                       preferred_element_type=jnp.float32)
        conv += jnp.dot(x.astype(jnp.bfloat16), w_ref[c:2 * c, :],
                        preferred_element_type=jnp.float32)
        conv += jnp.dot(x_p1.astype(jnp.bfloat16), w_ref[2 * c:3 * c, :],
                        preferred_element_type=jnp.float32)

    xr = x + conv                                        # TokenConv residual

    # LayerNorm over channels (eps=1e-5, biased variance), f32 throughout.
    p = p_ref[...].astype(jnp.float32)                   # (3, Co): gamma/beta/sw
    mu = jnp.mean(xr, axis=-1, keepdims=True)
    xc = xr - mu
    var = jnp.mean(xc * xc, axis=-1, keepdims=True)
    xn = xc * jax.lax.rsqrt(var + 1e-5) * p[0:1, :] + p[1:2, :]
    xn_ref[0] = xn.astype(xn_ref.dtype)

    # Lane-dense score: contract (8,Co) x (TN,Co) over the channel axis
    # (flash-attention-style NT dot_general) -> (8, TN); row 0 carries the
    # score.  This keeps the score output lane-major (no masked (TN,1) column
    # stores).  exp(score) -> token weight computed on the idle EUP here, so no
    # separate XLA pass over (B,N,1).
    sw8 = jnp.broadcast_to(p[2:3, :], (8, p.shape[1]))
    s8 = jax.lax.dot_general(sw8, xn, (((1,), (1,)), ((), ())),
                             preferred_element_type=jnp.float32)
    score_row = s8[0:1, :] + sb_ref[0, 0]                # (1, TN)
    weight_row = jnp.exp(score_row)                      # (1, TN)
    misc_ref[0, 0] = jnp.concatenate([score_row, weight_row], axis=0)


def ctm_head(x, w_cat, packed_params, score_bias, *, tn=None):
    """x: (B,N,C); w_cat: (3C,Co) bf16 stacked conv taps; packed_params:
    (3,Co) f32 (gamma/beta/score_w); score_bias: (1,1) f32 (SMEM).
    Returns (xn (B,N,Co), token_score (B,N,1) f32, token_weight (B,N,1) f32)."""
    B, N, C = x.shape
    Co = w_cat.shape[1]
    assert C % 8 == 0, "channel dim must be 8-aligned"
    if tn is None:
        tn = _pick_tile(N, 512, 8)      # big tile: kernel is HBM-bound
    assert N % tn == 0 and (tn % 8 == 0 or tn == N)
    nt = N // tn

    # Conv halo rows, precomputed once (already zero at the sequence ends) so
    # the kernel needs a single tiny extra input stream and no boundary gating.
    xz = jnp.pad(x, ((0, 0), (1, 1), (0, 0)))
    prev_rows = xz[:, 0:N:tn, :]                         # x[:, i*tn - 1], 0 @ i=0
    next_rows = xz[:, tn + 1::tn, :]                     # x[:, (i+1)*tn], 0 @ last
    halo = jnp.stack([prev_rows, next_rows], axis=2)     # (B, nt, 2, C)

    fuse_taps = (C % 128 == 0)
    kernel = functools.partial(_ctm_head_kernel, tn=tn, c=C, fuse_taps=fuse_taps)
    xn, misc = pl.pallas_call(
        kernel,
        out_shape=(jax.ShapeDtypeStruct((B, N, Co), x.dtype),
                   # lane-dense (2, tn) row pair per tile: [score, exp(score)]
                   jax.ShapeDtypeStruct((B, nt, 2, tn), jnp.float32)),
        grid=(B, nt),
        in_specs=[
            pl.BlockSpec((1, tn, C), lambda b, i: (b, i, 0)),
            pl.BlockSpec((1, 1, 2, C), lambda b, i: (b, i, 0, 0)),
            # stacked conv tap weights (3C, Co) bf16 — one resident VMEM block.
            pl.BlockSpec((3 * C, Co), lambda b, i: (0, 0)),
            # gamma / beta / score_w packed into one small VMEM block.
            pl.BlockSpec((3, Co), lambda b, i: (0, 0)),
            # scalar score bias in SMEM.
            pl.BlockSpec(memory_space=pltpu.MemorySpace.SMEM),
        ],
        out_specs=(pl.BlockSpec((1, tn, Co), lambda b, i: (b, i, 0)),
                   pl.BlockSpec((1, 1, 2, tn), lambda b, i: (b, i, 0, 0))),
        compiler_params=pltpu.CompilerParams(
            dimension_semantics=("parallel", "parallel"),
            vmem_limit_bytes=32 * 1024 * 1024),
    )(x, halo, w_cat, packed_params, score_bias)

    token_score = misc[:, :, 0, :].reshape(B, N, 1)
    token_weight = misc[:, :, 1, :].reshape(B, N, 1)
    return xn, token_score, token_weight


# ------------------------------------------------------------------
# Kernel 2: pairwise Euclidean distance (torch.cdist) / sqrt(C), tiled.
# ------------------------------------------------------------------
def _cdist_kernel(xq_ref, xk_ref, d_ref, *, inv_c):
    xq = xq_ref[0].astype(jnp.float32)        # (TQ, C)
    xk = xk_ref[0].astype(jnp.float32)        # (TK, C)
    sq_q = jnp.sum(xq * xq, axis=-1, keepdims=True)                 # (TQ, 1)
    # Lane-major row of squared norms via a tiny ones-matmul (avoids a
    # sublane->lane transpose of a (TK,1) column).
    ones8 = jnp.ones((8, xk.shape[1]), jnp.float32)
    sq_k = jax.lax.dot_general(ones8, xk * xk, (((1,), (1,)), ((), ())),
                               preferred_element_type=jnp.float32)[0:1, :]
    # Gram via NT dot_general (contract last dims) — no pre-transposed copy of
    # x in HBM.  Kept f32: cancellation-sensitive, feeds DPC-KNN ranking.
    # TODO(synk): bf16 operands with f32 accumulation on v7x once DPC-KNN
    # assignments are validated against the f32 path.
    g = jax.lax.dot_general(xq, xk, (((1,), (1,)), ((), ())),
                            preferred_element_type=jnp.float32)     # (TQ, TK)
    d2 = jnp.maximum(sq_q + sq_k - 2.0 * g, 0.0)
    d_ref[0] = jnp.sqrt(d2 * inv_c).astype(d_ref.dtype)             # fold 1/sqrt(C)


def pairwise_dist(x, *, tq=None, tk=None, out_dtype=jnp.float32):
    B, N, C = x.shape
    if tq is None:
        tq = _pick_tile(N, 256, 8)
    if tk is None:
        tk = _pick_tile(N, 256, 128)    # 256-aligned result columns for v6e/v7x
    assert N % tq == 0 and N % tk == 0
    assert tq % 8 == 0 or tq == N
    assert tk % 128 == 0 or tk == N
    kernel = functools.partial(_cdist_kernel, inv_c=1.0 / C)
    # TODO(synk): fuse the k-NN / density reduction into this kernel to avoid
    # re-reading the full (B,N,N) matrix from HBM in the DPC-KNN glue.
    return pl.pallas_call(
        kernel,
        out_shape=jax.ShapeDtypeStruct((B, N, N), out_dtype),
        grid=(B, N // tq, N // tk),
        in_specs=[pl.BlockSpec((1, tq, C), lambda b, q, k: (b, q, 0)),
                  pl.BlockSpec((1, tk, C), lambda b, q, k: (b, k, 0))],
        out_specs=pl.BlockSpec((1, tq, tk), lambda b, q, k: (b, q, k)),
        compiler_params=pltpu.CompilerParams(
            dimension_semantics=("parallel", "parallel", "parallel"),
            vmem_limit_bytes=32 * 1024 * 1024),
    )(x, x)


# ------------------------------------------------------------------
# DPC-KNN clustering + token merge (data-dependent glue, plain JAX)
# ------------------------------------------------------------------
def cluster_dpc_knn_jax(dist_matrix, cluster_num, k, rng_key):
    B, N, _ = dist_matrix.shape
    neg_topk, _ = jax.lax.top_k(-dist_matrix, k)           # k smallest dists
    dist_nearest = -neg_topk
    density = jnp.exp(-(dist_nearest.astype(jnp.float32) ** 2).mean(axis=-1))
    # deterministic tie-break (torch used torch.rand * 1e-6)
    density = density + jax.random.uniform(rng_key, density.shape,
                                           dtype=density.dtype) * 1e-6
    mask = (density[:, None, :] > density[:, :, None]).astype(dist_matrix.dtype)
    dist_max = dist_matrix.reshape(B, -1).max(axis=-1)[:, None, None]
    dist = (dist_matrix * mask + dist_max * (1.0 - mask)).min(axis=-1)
    score = dist * density
    _, index_down = jax.lax.top_k(score, cluster_num)      # (B, cluster_num)
    dist_sel = jnp.take_along_axis(dist_matrix, index_down[:, :, None], axis=1)
    idx_cluster = jnp.argmin(dist_sel, axis=1)              # (B, N)
    idx_tmp = jnp.broadcast_to(jnp.arange(cluster_num)[None, :], (B, cluster_num))
    idx_cluster = jax.vmap(lambda ic, idn, it: ic.at[idn].set(it))(
        idx_cluster, index_down, idx_tmp)
    return idx_cluster, cluster_num


def merge_tokens_jax(x, idx_token, agg_weight, idx_cluster, cluster_num,
                     token_weight):
    B, N, C = x.shape
    idx = idx_cluster + jnp.arange(B)[:, None] * cluster_num   # (B, N)
    flat_idx = idx.reshape(B * N)
    token_weight = token_weight.astype(jnp.float32)            # keep weights f32
    all_weight = (jnp.zeros((B * cluster_num, 1), jnp.float32)
                  .at[flat_idx].add(token_weight.reshape(B * N, 1)) + 1e-6)
    norm_weight = token_weight / all_weight[idx]                # (B, N, 1)
    source = (x.astype(jnp.float32) * norm_weight).reshape(B * N, C)
    x_merged = (jnp.zeros((B * cluster_num, C), jnp.float32)
                .at[flat_idx].add(source)).reshape(B, cluster_num, C).astype(x.dtype)
    idx_token_new = jnp.take_along_axis(idx_cluster, idx_token, axis=1)
    weight_t = jnp.take_along_axis(norm_weight, idx_token[:, :, None], axis=1)
    agg_weight_new = agg_weight * weight_t
    return {'x': x_merged, 'token_num': cluster_num,
            'idx_token': idx_token_new, 'agg_weight': agg_weight_new,
            'mask': None}


# ------------------------------------------------------------------
# CTM forward
# ------------------------------------------------------------------
def init_params(key, embed_dim, dim_out):
    k1, k2, k3 = jax.random.split(key, 3)
    conv_w = jax.random.normal(k1, (dim_out, embed_dim, 3), jnp.float32) * 0.05
    ln_gamma = jnp.ones((dim_out,), jnp.float32)
    ln_beta = jnp.zeros((dim_out,), jnp.float32)
    score_w = jax.random.normal(k2, (1, dim_out), jnp.float32) * 0.05
    score_b = jax.random.normal(k3, (1,), jnp.float32) * 0.05
    return conv_w, ln_gamma, ln_beta, score_w, score_b


def ctm_forward(token_dict, params, k=5, rng_key=None, tn=None, tq=None, tk=None):
    # TODO(synk): token_dict['mask'] != None path (masked_fill -inf on scores)
    # not wired; the reference default usage has mask=None.
    x = token_dict['x']
    conv_w, gamma, beta, score_w, score_b = params
    Co, Ci, _ = conv_w.shape
    # Conv1d weight [Co, Ci, 3] -> stacked tap matrix [3*Ci, Co], bf16 for MXU.
    w_cat = jnp.transpose(conv_w, (2, 1, 0)).reshape(3 * Ci, Co).astype(jnp.bfloat16)
    packed = jnp.stack([gamma, beta, score_w[0]], axis=0).astype(jnp.float32)
    sb = score_b.reshape(1, 1).astype(jnp.float32)

    # token_weight = exp(score) comes straight out of the fused head kernel.
    xn, token_score, token_weight = ctm_head(x, w_cat, packed, sb, tn=tn)

    new_dict = dict(token_dict)
    new_dict['x'] = xn
    new_dict['token_score'] = token_score

    cluster_num = max(2, 1)                                  # as in the reference
    dist = pairwise_dist(xn, tq=tq, tk=tk)
    idx_cluster, cluster_num = cluster_dpc_knn_jax(dist, cluster_num, k, rng_key)
    down_dict = merge_tokens_jax(xn, new_dict['idx_token'],
                                 new_dict['agg_weight'], idx_cluster,
                                 cluster_num, token_weight)
    return down_dict, new_dict


# Pure-JAX reference of the fused head (validates halo / shift handling).
def _head_reference(x, conv_w, gamma, beta, score_w, score_b):
    B, N, C = x.shape
    w0, w1, w2 = conv_w[:, :, 0].T, conv_w[:, :, 1].T, conv_w[:, :, 2].T
    zero = jnp.zeros((B, 1, C), x.dtype)
    x_m1 = jnp.concatenate([zero, x[:, :-1]], axis=1)
    x_p1 = jnp.concatenate([x[:, 1:], zero], axis=1)
    xr = x + (x_m1 @ w0 + x @ w1 + x_p1 @ w2)
    mu = xr.mean(-1, keepdims=True)
    var = ((xr - mu) ** 2).mean(-1, keepdims=True)
    xn = (xr - mu) * jax.lax.rsqrt(var + 1e-5) * gamma + beta
    score = xn @ score_w.T + score_b
    return xn, score


if __name__ == "__main__":
    # embed_dim == dim_out (required by the TokenConv residual); C=128 so the
    # fused single-matmul conv path (C % 128 == 0) is exercised; tn=16 / tq=16
    # so halo exchange and q-tiling are exercised.
    B, N, C = 2, 32, 128
    key = jax.random.PRNGKey(0)
    kx, kp = jax.random.split(key)
    x = jax.random.normal(kx, (B, N, C), jnp.float32)
    params = init_params(kp, C, C)
    token_dict = {
        'x': x,
        'token_num': N,
        'idx_token': jnp.broadcast_to(jnp.arange(N, dtype=jnp.int32)[None, :], (B, N)),
        'agg_weight': jnp.ones((B, N, 1), jnp.float32),
        'mask': None,
    }
    down_dict, out_dict = ctm_forward(token_dict, params, k=5,
                                      rng_key=jax.random.PRNGKey(1),
                                      tn=16, tq=16)
    jax.block_until_ready((down_dict['x'], down_dict['agg_weight'],
                           down_dict['idx_token'], out_dict['x'],
                           out_dict['token_score']))

    assert down_dict['x'].shape == (B, 2, C)
    assert out_dict['x'].shape == (B, N, C)
    assert out_dict['token_score'].shape == (B, N, 1)

    # numerical check of the fused head vs a pure-JAX reference
    # (loose tolerance: kernel uses bf16 MXU operands with f32 accumulation).
    xn_ref, score_ref = _head_reference(x, *params)
    assert float(jnp.max(jnp.abs(out_dict['x'] - xn_ref))) < 0.1
    assert float(jnp.max(jnp.abs(out_dict['token_score'] - score_ref))) < 0.1

    # numerical check of the tiled cdist kernel vs a direct-difference reference
    xk = out_dict['x']
    dref = jnp.sqrt(jnp.maximum(
        jnp.sum((xk[:, :, None, :] - xk[:, None, :, :]) ** 2, axis=-1), 0.0)) / (C ** 0.5)
    dkrn = pairwise_dist(xk, tq=16)
    assert float(jnp.max(jnp.abs(dkrn - dref))) < 5e-3

    print("KERNEL_OK")
</pallas_src>

<mosaic_0001>
module attributes {stable_mosaic.version = 11 : i64} {
  func.func @_ctm_head_kernel(%arg0: i32, %arg1: i32, %arg2: memref<1x16x128xf32, #tpu.memory_space<vmem>>, %arg3: memref<1x1x2x128xf32, #tpu.memory_space<vmem>>, %arg4: memref<384x128xbf16, #tpu.memory_space<vmem>>, %arg5: memref<3x128xf32, #tpu.memory_space<vmem>>, %arg6: memref<1x1xf32, #tpu.memory_space<smem>>, %arg7: memref<1x16x128xf32, #tpu.memory_space<vmem>>, %arg8: memref<1x1x2x16xf32, #tpu.memory_space<vmem>>) attributes {dimension_semantics = [#tpu.dimension_semantics<parallel>, #tpu.dimension_semantics<parallel>], iteration_bounds = array<i64: 2, 2>, scalar_prefetch = 0 : i64, scratch_operands = 0 : i64, tpu.core_type = #tpu.core_type<tc>, window_params = [{transform_indices = @transform_0, window_bounds = array<i64: 1, 16, 128>}, {transform_indices = @transform_1, window_bounds = array<i64: 1, 1, 2, 128>}, {pipeline_mode = #tpu.pipeline_mode<synchronous>, transform_indices = @transform_2, window_bounds = array<i64: 384, 128>}, {pipeline_mode = #tpu.pipeline_mode<synchronous>, transform_indices = @transform_3, window_bounds = array<i64: 3, 128>}, {transform_indices = @transform_4, window_bounds = array<i64: 1, 1>}, {transform_indices = @transform_5, window_bounds = array<i64: 1, 16, 128>}, {transform_indices = @transform_6, window_bounds = array<i64: 1, 1, 2, 16>}]} {
    %c0 = arith.constant 0 : index
    %c0_0 = arith.constant 0 : index
    %c0_1 = arith.constant 0 : index
    %0 = vector.load %arg2[%c0, %c0_0, %c0_1] : memref<1x16x128xf32, #tpu.memory_space<vmem>>, vector<1x16x128xf32>
    %1 = vector.shape_cast %0 : vector<1x16x128xf32> to vector<16x128xf32>
    %c0_2 = arith.constant 0 : index
    %c0_3 = arith.constant 0 : index
    %c0_4 = arith.constant 0 : index
    %c0_5 = arith.constant 0 : index
    %2 = vector.load %arg3[%c0_2, %c0_3, %c0_4, %c0_5] : memref<1x1x2x128xf32, #tpu.memory_space<vmem>>, vector<1x1x2x128xf32>
    %3 = vector.shape_cast %2 : vector<1x1x2x128xf32> to vector<2x128xf32>
    %4 = vector.extract_strided_slice %3 {offsets = [0, 0], sizes = [1, 128], strides = [1, 1]} : vector<2x128xf32> to vector<1x128xf32>
    %5 = vector.extract_strided_slice %3 {offsets = [1, 0], sizes = [1, 128], strides = [1, 1]} : vector<2x128xf32> to vector<1x128xf32>
    %6 = tpu.iota {dimensions = array<i32: 0>} : vector<16x1xi32>
    %c0_i32 = arith.constant 0 : i32
    %7 = vector.broadcast %c0_i32 : i32 to vector<16x1xi32>
    %8 = arith.cmpi eq, %6, %7 : vector<16x1xi32>
    %c1_i32 = arith.constant 1 : i32
    %9 = tpu.dynamic_rotate %1 by %c1_i32 dim 0 : vector<16x128xf32>, i32 -> vector<16x128xf32>
    %10 = vector.shape_cast %8 : vector<16x1xi1> to vector<16x1xi1>
    %11 = vector.broadcast %10 : vector<16x1xi1> to vector<16x128xi1>
    %12 = vector.shape_cast %4 : vector<1x128xf32> to vector<1x128xf32>
    %13 = vector.broadcast %12 : vector<1x128xf32> to vector<16x128xf32>
    %14 = arith.select %11, %13, %9 : vector<16x128xi1>, vector<16x128xf32>
    %c15_i32 = arith.constant 15 : i32
    %15 = vector.broadcast %c15_i32 : i32 to vector<16x1xi32>
    %16 = arith.cmpi eq, %6, %15 : vector<16x1xi32>
    %c15_i32_6 = arith.constant 15 : i32
    %17 = tpu.dynamic_rotate %1 by %c15_i32_6 dim 0 : vector<16x128xf32>, i32 -> vector<16x128xf32>
    %18 = vector.shape_cast %16 : vector<16x1xi1> to vector<16x1xi1>
    %19 = vector.broadcast %18 : vector<16x1xi1> to vector<16x128xi1>
    %20 = vector.shape_cast %5 : vector<1x128xf32> to vector<1x128xf32>
    %21 = vector.broadcast %20 : vector<1x128xf32> to vector<16x128xf32>
    %22 = arith.select %19, %21, %17 : vector<16x128xi1>, vector<16x128xf32>
    %23 = tpu.concatenate %14, %1, %22 in 1 : vector<16x128xf32>, vector<16x128xf32>, vector<16x128xf32> -> vector<16x384xf32>
    %24 = arith.truncf %23 : vector<16x384xf32> to vector<16x384xbf16>
    %c0_7 = arith.constant 0 : index
    %c0_8 = arith.constant 0 : index
    %25 = vector.load %arg4[%c0_7, %c0_8] : memref<384x128xbf16, #tpu.memory_space<vmem>>, vector<384x128xbf16>
    %cst = arith.constant dense<0.000000e+00> : vector<16x128xf32>
    %26 = tpu.matmul %24, %25, %cst {dimension_numbers = #tpu.dot_dimension_numbers<[1], [0], [0], [1], [0, 0, 1, 1], [], []>} : vector<16x384xbf16>, vector<384x128xbf16>, vector<16x128xf32> -> vector<16x128xf32>
    %27 = arith.addf %1, %26 : vector<16x128xf32>
    %c0_9 = arith.constant 0 : index
    %c0_10 = arith.constant 0 : index
    %28 = vector.load %arg5[%c0_9, %c0_10] : memref<3x128xf32, #tpu.memory_space<vmem>>, vector<3x128xf32>
    %cst_11 = arith.constant dense<0.000000e+00> : vector<16xf32>
    %29 = vector.multi_reduction <add>, %27, %cst_11 [1] : vector<16x128xf32> to vector<16xf32>
    %30 = vector.shape_cast %29 : vector<16xf32> to vector<16x1xf32>
    %cst_12 = arith.constant 1.280000e+02 : f32
    %31 = vector.broadcast %cst_12 : f32 to vector<16x1xf32>
    %32 = arith.divf %30, %31 : vector<16x1xf32>
    %33 = vector.broadcast %32 : vector<16x1xf32> to vector<16x128xf32>
    %34 = arith.subf %27, %33 : vector<16x128xf32>
    %35 = arith.mulf %34, %34 : vector<16x128xf32>
    %cst_13 = arith.constant dense<0.000000e+00> : vector<16xf32>
    %36 = vector.multi_reduction <add>, %35, %cst_13 [1] : vector<16x128xf32> to vector<16xf32>
    %37 = vector.shape_cast %36 : vector<16xf32> to vector<16x1xf32>
    %cst_14 = arith.constant 1.280000e+02 : f32
    %38 = vector.broadcast %cst_14 : f32 to vector<16x1xf32>
    %39 = arith.divf %37, %38 : vector<16x1xf32>
    %cst_15 = arith.constant 9.99999974E-6 : f32
    %40 = vector.broadcast %cst_15 : f32 to vector<16x1xf32>
    %41 = arith.addf %39, %40 : vector<16x1xf32>
    %42 = math.rsqrt %41 : vector<16x1xf32>
    %43 = vector.broadcast %42 : vector<16x1xf32> to vector<16x128xf32>
    %44 = arith.mulf %34, %43 : vector<16x128xf32>
    %45 = vector.extract_strided_slice %28 {offsets = [0, 0], sizes = [1, 128], strides = [1, 1]} : vector<3x128xf32> to vector<1x128xf32>
    %46 = vector.broadcast %45 : vector<1x128xf32> to vector<16x128xf32>
    %47 = arith.mulf %44, %46 : vector<16x128xf32>
    %48 = vector.extract_strided_slice %28 {offsets = [1, 0], sizes = [1, 128], strides = [1, 1]} : vector<3x128xf32> to vector<1x128xf32>
    %49 = vector.broadcast %48 : vector<1x128xf32> to vector<16x128xf32>
    %50 = arith.addf %47, %49 : vector<16x128xf32>
    %c0_16 = arith.constant 0 : index
    %c0_17 = arith.constant 0 : index
    %c0_18 = arith.constant 0 : index
    %51 = vector.load %arg7[%c0_16, %c0_17, %c0_18] : memref<1x16x128xf32, #tpu.memory_space<vmem>>, vector<1x16x128xf32>
    %52 = vector.shape_cast %51 : vector<1x16x128xf32> to vector<16x128xf32>
    %53 = vector.shape_cast %50 : vector<16x128xf32> to vector<1x16x128xf32>
    tpu.vector_store %arg7[%c0_16, %c0_17, %c0_18], %53 {strides = array<i32>} : memref<1x16x128xf32, #tpu.memory_space<vmem>>, vector<1x16x128xf32>,
    %54 = vector.extract_strided_slice %28 {offsets = [2, 0], sizes = [1, 128], strides = [1, 1]} : vector<3x128xf32> to vector<1x128xf32>
    %55 = vector.shape_cast %54 : vector<1x128xf32> to vector<1x128xf32>
    %56 = vector.broadcast %55 : vector<1x128xf32> to vector<8x128xf32>
    %cst_19 = arith.constant dense<0.000000e+00> : vector<8x16xf32>
    %57 = tpu.matmul %56, %50, %cst_19 {dimension_numbers = #tpu.dot_dimension_numbers<[1], [1], [0], [0], [0, 0, 1, 0], [], []>} : vector<8x128xf32>, vector<16x128xf32>, vector<8x16xf32> -> vector<8x16xf32>
    %58 = vector.extract_strided_slice %57 {offsets = [0, 0], sizes = [1, 16], strides = [1, 1]} : vector<8x16xf32> to vector<1x16xf32>
    %c0_20 = arith.constant 0 : index
    %c0_21 = arith.constant 0 : index
    %59 = memref.load %arg6[%c0_20, %c0_21] : memref<1x1xf32, #tpu.memory_space<smem>>
    %60 = vector.broadcast %59 : f32 to vector<1x16xf32>
    %61 = arith.addf %58, %60 : vector<1x16xf32>
    %62 = math.exp %61 : vector<1x16xf32>
    %63 = tpu.concatenate %61, %62 in 0 : vector<1x16xf32>, vector<1x16xf32> -> vector<2x16xf32>
    %c0_22 = arith.constant 0 : index
    %c0_23 = arith.constant 0 : index
    %c0_24 = arith.constant 0 : index
    %c0_25 = arith.constant 0 : index
    %64 = vector.load %arg8[%c0_22, %c0_23, %c0_24, %c0_25] : memref<1x1x2x16xf32, #tpu.memory_space<vmem>>, vector<1x1x2x16xf32>
    %65 = vector.shape_cast %64 : vector<1x1x2x16xf32> to vector<2x16xf32>
    %66 = vector.shape_cast %63 : vector<2x16xf32> to vector<1x1x2x16xf32>
    tpu.vector_store %arg8[%c0_22, %c0_23, %c0_24, %c0_25], %66 {strides = array<i32>} : memref<1x1x2x16xf32, #tpu.memory_space<vmem>>, vector<1x1x2x16xf32>,
    return
  }
  func.func @transform_0(%arg0: i32, %arg1: i32) -> (i32, i32, i32) {
    %c0_i32 = arith.constant 0 : i32
    %c0_i32_0 = arith.constant 0 : i32
    return %arg0, %arg1, %c0_i32 : i32, i32, i32
  }
  func.func @transform_1(%arg0: i32, %arg1: i32) -> (i32, i32, i32, i32) {
    %c0_i32 = arith.constant 0 : i32
    %c0_i32_0 = arith.constant 0 : i32
    %c0_i32_1 = arith.constant 0 : i32
    return %arg0, %arg1, %c0_i32, %c0_i32_0 : i32, i32, i32, i32
  }
  func.func @transform_2(%arg0: i32, %arg1: i32) -> (i32, i32) {
    %c0_i32 = arith.constant 0 : i32
    %c0_i32_0 = arith.constant 0 : i32
    %c0_i32_1 = arith.constant 0 : i32
    return %c0_i32, %c0_i32_0 : i32, i32
  }
  func.func @transform_3(%arg0: i32, %arg1: i32) -> (i32, i32) {
    %c0_i32 = arith.constant 0 : i32
    %c0_i32_0 = arith.constant 0 : i32
    %c0_i32_1 = arith.constant 0 : i32
    return %c0_i32, %c0_i32_0 : i32, i32
  }
  func.func @transform_4(%arg0: i32, %arg1: i32) -> (i32, i32) {
    %c0_i32 = arith.constant 0 : i32
    %c0_i32_0 = arith.constant 0 : i32
    %c0_i32_1 = arith.constant 0 : i32
    return %c0_i32, %c0_i32_0 : i32, i32
  }
  func.func @transform_5(%arg0: i32, %arg1: i32) -> (i32, i32, i32) {
    %c0_i32 = arith.constant 0 : i32
    %c0_i32_0 = arith.constant 0 : i32
    return %arg0, %arg1, %c0_i32 : i32, i32, i32
  }
  func.func @transform_6(%arg0: i32, %arg1: i32) -> (i32, i32, i32, i32) {
    %c0_i32 = arith.constant 0 : i32
    %c0_i32_0 = arith.constant 0 : i32
    %c0_i32_1 = arith.constant 0 : i32
    return %arg0, %arg1, %c0_i32, %c0_i32_0 : i32, i32, i32, i32
  }
}

</mosaic_0001>

<bundles_post_ra>
// kernel: tpu_custom_call.1
= control target key start
LH: loop header
LB: loop body
LE: loop exit
PB: predicated region body
PF: predicated region fallthrough
CT: control target
= control target key end

     0   :  { %s1894_s0 = inlined_call_operand.hbm [shape: f32[2,32,128], index: 0, kind: input, shape index: {}]   ;;  %s1895_s1 = inlined_call_operand.hbm [shape: f32[2,2,2,128], index: 1, kind: input, shape index: {}]   ;;  %s1896_s2 = inlined_call_operand.hbm [shape: bf16[384,128], index: 2, kind: input, shape index: {}]   ;;  %s1897_s3 = inlined_call_operand.vmem [shape: f32[3,128], index: 3, kind: input, shape index: {}]   ;;  %s1898_s4 = inlined_call_operand.<no memory space> [shape: f32[1,1], index: 4, kind: input, shape index: {}]   ;;  %s1899_s5 = inlined_call_operand.hbm [shape: f32[2,32,128], index: 5, kind: output, shape index: {0}]   ;;  %s1900_s6 = inlined_call_operand.hbm [shape: f32[2,2,2,16], index: 6, kind: output, shape index: {1}]  }
   0x1   :  { %1911 = sst [smem:[#allocation23_spill]] %s1894_s0 }
   0x2   :  { %1912 = sst [smem:[#allocation24_spill]] %s1896_s2 }
   0x3   :  { %1913 = sst [smem:[#allocation25_spill]] %s1899_s5 }
   0x4   :  { %1914 = sst [smem:[#allocation26_spill]] %s1900_s6 }
   0x5   :  { %12 = sst [smem:[#allocation2]] %s1898_s4 }
   0x6   :  { %13 = vsyncpa [#allocation4], 0 }
   0x7   :  { %15 = vsyncpa [#allocation4 + $0x1], 0 }
   0x8   :  { %16 = vsyncpa [#allocation7], 0 }
   0x9   :  { %18 = vsyncpa [#allocation7 + $0x1], 0 }
   0xa   :  { %19 = vsyncpa [#allocation5], 0 }
   0xb   :  { %21 = vsyncpa [#allocation5 + $0x1], 0 }
   0xc   :  { %22 = vsyncpa [#allocation11], 0 }
   0xd   :  { %24 = vsyncpa [#allocation11 + $0x1], 0  ;;  %s1530_s23 = smov 0   ;;  %s1532_s24 = smov 0  }
   0xe   :  { %s1534_s25 = smov 0   ;;  %s1536_s26 = smov 0  }
   0xf   :  { %s1538_s27 = smov 0   ;;  %s1540_s28 = smov 0  }
  0x10   :  { %s1542_s4 = smov 0   ;;  %s1544_s29 = smov 0  }
  0x11 LB: > { %1915 = sst [smem:[#allocation17_spill]] %s1448_s23  ;;  %s1571_s30 = sadd.s32 4294967295, %s1476_s29   ;;  %s1476_s29 = sphi %s1544_s29, %s30_s29   ;;  %s1472_s4 = sphi %s1542_s4, %s1949_s4   ;;  %s1468_s28 = sphi %s1540_s28, %s1948_s28   ;;  %s1464_s27 = sphi %s1538_s27, %s1947_s27   ;;  %s1460_s26 = sphi %s1536_s26, %s1946_s26   ;;  %s1456_s25 = sphi %s1534_s25, %s1941_s25   ;;  %s1452_s24 = sphi %s1532_s24, %s1945_s24   ;;  %s1448_s23 = sphi %s1530_s23, %s1944_s23  }
  0x12   : > { %1916 = sst [smem:[#allocation18_spill]] %s1456_s25  ;;  %s998_s7 = sadd.s32 4294967294, %s1476_s29  }
  0x13   : > { %p64_p0 = scmp.ne.s32.totalorder %s1452_s24, %s1448_s23  ;;  %p1901_p1 = scmp.eq.s32.totalorder %s1571_s30, 0 }
  0x14   : > { %p187_p3 = scmp.eq.s32.totalorder %s998_s7, 3  ;;  %p999_p5 = scmp.ge.s32.totalorder %s1476_s29, 1 }
  0x15   : > { %p1580_p4 = por %p1901_p1, %p64_p0  ;;  %p222_p7 = scmp.lt.s32.totalorder %s1476_s29, 5 }
  0x16   : > { %p1585_p6 = por %p187_p3, %p64_p0  ;;  %s1478_s11 = smov [#allocation8]  }
  0x17   : > { %s1917_s8 = scalar_select %p1580_p4, 1, 0 }
  0x18   : > { %s1918_s9 = scalar_select %p1585_p6, 1, 0 }
  0x19   : > { %p1590_p8 = pnand %p999_p5, %p222_p7  ;;  %s234_s12 = sshll.u32 %s1478_s11, 4  ;;  %s235_s12 = int_to_ptr.vmem [resolvable:$true] %s234_s12 }
  0x1a   : > { %1919 = sst [smem:[#allocation19_spill]] %s1918_s9 }
  0x1b   : > { %s1920_s10 = scalar_select %p1590_p8, 1, 0 }
  0x1c   : > { %p1124_p9 = pneg %p1590_p8  ;;  %s1922_s2 = sld [smem:[#allocation24_spill]] }
  0x1e   : > { %p1598_p10 = pnand %p1124_p9, %p1901_p1 }
  0x20   : > { %p1252_p12 = pneg %p1598_p10 }
  0x22   : > { %s1250_s16 = scalar_lea.hbm %s1922_s2, 3072 }
  0x23   : > { %p1251_p11 = scmp.ne.s32.totalorder %s1922_s2, %s1250_s16  ;;  %p1257_p3 = scmp.lt.u32.totalorder %s1250_s16, %s1922_s2 }
  0x25   : > { %p1253_p13 = pnand %p1252_p12, %p1251_p11 }
  0x27   : > { %p1254_p0 = pneg %p1253_p13 }
  0x29   : > { %p1259_p5 = pnand %p1257_p3, %p1254_p0 }
  0x2b   : > { %1262 = shalt.err (!%p1259_p5)
}
  0x2c   : > { %s1263_s21 = scalar_lea.vmem %s235_s12, 3072  ;;  %p1271_p2 = scmp.lt.s32.totalorder %s235_s12, %s235_s12 }
  0x2d   : > { %p1264_p7 = scmp.ne.s32.totalorder %s235_s12, %s1263_s21  ;;  %p1272_p6 = scmp.lt.s32.totalorder %s1263_s21, %s1263_s21 }
  0x2f   : > { %p1266_p9 = pnand %p1264_p7, %p1252_p12  ;;  %p1273_p4 = por %p1272_p6, %p1271_p2 }
  0x31   : > { %p1267_p1 = pneg %p1266_p9 }
  0x33   : > { %p1274_p8 = pnand %p1273_p4, %p1267_p1 }
  0x35   : > { %1277 = shalt.err (!%p1274_p8)
}
  0x36   : > { %s1479_s22 = smov 64   ;;  %s1480_s7 = smov 4  }
  0x37   : > { %1127 = dma.hbm_to_vmem [thread:$0]  (!%p1598_p10), %s1922_s2, 3072, %s235_s12, [#allocation7], %s1479_s22, %s1479_s22, %s1480_s7  }
  0x38   : > { %s39_s15 = sadd.s32 1, %s1468_s28  ;;  %s42_s16 = sadd.s32 1, %s1472_s4 }
  0x39   : > { %p40_p1 = scmp.ge.s32.totalorder %s39_s15, 2  ;;  %s51_s17 = sadd.s32 1, %s1456_s25 }
  0x3a   : > { %p58_p2 = scmp.ne.s32.totalorder %s1456_s25, %s1452_s24  ;;  %p59_p4 = scmp.eq.s32.totalorder %s1476_s29, 0 }
  0x3b   : > { %s1951_s15 = smov (%p40_p1, %s39_s15), 0  ;;  %s1953_s16 = smov (!%p40_p1, %s42_s16), %s1472_s4 }
  0x3c   : > { %1923 = sst [smem:[#allocation20_spill]] %s1951_s15  ;;  %s47_s18 = ssub.s32 %s1468_s28, %s1951_s15 }
  0x3d   : > { %p44_p6 = scmp.ge.s32.totalorder %s1953_s16, 2  ;;  %p1924_p8 = scmp.eq.s32.totalorder %s1571_s30, 3 }
  0x3e   : > { %p1635_p10 = por %p59_p4, %p58_p2  ;;  %p1143_p12 = scmp.lt.s32.totalorder %s1476_s29, 4 }
  0x3f   : > { %p1631_p11 = por %p1924_p8, %p58_p2  ;;  %s1955_s16 = smov (%p44_p6, %s1953_s16), 0 }
  0x40   : > { %1927 = sst [smem:[#allocation21_spill]] %s1955_s16  ;;  %s1643_s19 = sand.u32 1, %s1456_s25  }
  0x41   : > { %s1003_s20 = sshll.u32 %s1468_s28, 1  ;;  %s46_s21 = ssub.s32 %s1472_s4, %s1955_s16 }
  0x42   : > { %s48_s22 = sor.u32 %s47_s18, %s46_s21  ;;  %s1002_s7 = sshll.u32 %s1643_s19, 4 }
  0x43   : > { %p49_p13 = scmp.eq.s32.totalorder %s48_s22, 0  ;;  %s1004_s11 = sshll.u32 %s1472_s4, 2 }
  0x44   : > { %s258_s14 = scalar_lea.vmem [#allocation3], %s1002_s7  ;;  %s264_s9 = sadd.s32 %s1004_s11, %s1003_s20 }
  0x45   : > { %s267_s2 = sshll.u32 %s258_s14, 4  ;;  %s1005_s23 = sshll.u32 %s264_s9, 7  ;;  %s1653_s2 = int_to_ptr.vmem [resolvable:$true] %s267_s2 }
  0x46   : > { %s1651_s15 = scalar_select %p49_p13, %s1456_s25, %s51_s17  }
  0x47   : > { %p1659_p0 = pnand %p1143_p12, %p1635_p10  ;;  %s1930_s0 = sld [smem:[#allocation23_spill]] }
  0x48   : > { %1928 = sst [smem:[#allocation22_spill]] %s1651_s15  ;;  %s255_s17 = scalar_lea.sflag [#allocation4], %s1643_s19 }
  0x49   : > { %p1280_p5 = pneg %p1659_p0 }
  0x4d   : > { %s1666_s18 = scalar_lea.hbm %s1930_s0, %s1005_s23  ;;  %s1283_s5 = scalar_lea.hbm %s1930_s0, 1024 }
  0x4e   : > { %s1278_s20 = scalar_lea.hbm %s1666_s18, 256  ;;  %p1284_p1 = scmp.lt.u32.totalorder %s1666_s18, %s1930_s0 }
  0x4f   : > { %p1279_p3 = scmp.ne.s32.totalorder %s1666_s18, %s1278_s20  ;;  %p1285_p2 = scmp.lt.u32.totalorder %s1283_s5, %s1278_s20 }
  0x50   : > { %p1287_p6 = scmp.lt.u32.totalorder %s1278_s20, %s1666_s18 }
  0x51   : > { %p1281_p7 = pnand %p1280_p5, %p1279_p3  ;;  %p1286_p4 = por %p1285_p2, %p1284_p1 }
  0x53   : > { %p1282_p9 = pneg %p1281_p7  ;;  %p1288_p8 = por %p1287_p6, %p1286_p4 }
  0x55   : > { %p1289_p10 = pnand %p1288_p8, %p1282_p9 }
  0x57   : > { %1292 = shalt.err (!%p1289_p10)
}
  0x58   : > { %s1293_s21 = scalar_lea.vmem %s1653_s2, 256  ;;  %s1481_s22 = smov [#allocation3]  }
  0x59   : > { %p1294_p12 = scmp.ne.s32.totalorder %s1653_s2, %s1293_s21  ;;  %s1298_s7 = sshll.u32 %s1481_s22, 4  ;;  %s1299_s7 = int_to_ptr.vmem [resolvable:$false] %s1298_s7 }
  0x5a   : > { %s1300_s11 = scalar_lea.vmem %s1299_s7, 512  ;;  %p1301_p7 = scmp.lt.s32.totalorder %s1653_s2, %s1299_s7 }
  0x5b   : > { %p1296_p13 = pnand %p1294_p12, %p1280_p5  ;;  %p1302_p1 = scmp.lt.s32.totalorder %s1300_s11, %s1293_s21 }
  0x5d   : > { %p1297_p3 = pneg %p1296_p13  ;;  %p1303_p2 = por %p1302_p1, %p1301_p7 }
  0x5f   : > { %p1304_p4 = pnand %p1303_p2, %p1297_p3 }
  0x61   : > { %1307 = shalt.err (!%p1304_p4)
}
  0x62   : > { %s1482_s14 = smov 128   ;;  %s1483_s20 = smov 8  }
  0x63   : > { %1131 = dma.hbm_to_vmem [thread:$0]  (!%p1659_p0), %s1666_s18, 256, %s1653_s2, %s255_s17, %s1482_s14, %s1482_s14, %s1483_s20  }
  0x64   : > { %s277_s9 = sand.u32 1, %s1476_s29   ;;  %s1006_s12 = sshll.u32 %s1643_s19, 1 }
  0x65   : > { %s1007_s5 = sshll.u32 %s1472_s4, 1  ;;  %s281_s16 = scalar_lea.vmem [#allocation6], %s1006_s12 }
  0x66   : > { %s290_s23 = sshll.u32 %s281_s16, 4  ;;  %s286_s21 = sadd.s32 %s1468_s28, %s1007_s5  ;;  %s1700_s23 = int_to_ptr.vmem [resolvable:$true] %s290_s23 }
  0x67   : > { %s1008_s22 = sshll.u32 %s286_s21, 5  ;;  %s278_s15 = scalar_lea.sflag [#allocation7], %s277_s9 }
  0x68   : > { %s288_s0 = scalar_lea.hbm %s1895_s1, %s1008_s22  ;;  %s1313_s18 = scalar_lea.hbm %s1895_s1, 128 }
  0x69   : > { %s1308_s25 = scalar_lea.hbm %s288_s0, 32  ;;  %p1314_p10 = scmp.lt.u32.totalorder %s288_s0, %s1895_s1 }
  0x6a   : > { %p1309_p9 = scmp.ne.s32.totalorder %s288_s0, %s1308_s25  ;;  %p1315_p12 = scmp.lt.u32.totalorder %s1313_s18, %s1308_s25 }
  0x6b   : > { %p1317_p3 = scmp.lt.u32.totalorder %s1308_s25, %s288_s0 }
  0x6c   : > { %p1311_p6 = pnand %p1309_p9, %p1280_p5  ;;  %p1316_p13 = por %p1315_p12, %p1314_p10 }
  0x6e   : > { %p1312_p8 = pneg %p1311_p6  ;;  %p1318_p7 = por %p1317_p3, %p1316_p13 }
  0x70   : > { %p1319_p1 = pnand %p1318_p7, %p1312_p8 }
  0x72   : > { %1322 = shalt.err (!%p1319_p1)
}
  0x73   : > { %s1323_s20 = scalar_lea.vmem %s1700_s23, 32  ;;  %s1484_s9 = smov [#allocation6]  }
  0x74   : > { %p1324_p2 = scmp.ne.s32.totalorder %s1700_s23, %s1323_s20  ;;  %s1328_s12 = sshll.u32 %s1484_s9, 4  ;;  %s1329_s12 = int_to_ptr.vmem [resolvable:$false] %s1328_s12 }
  0x75   : > { %s1330_s5 = scalar_lea.vmem %s1329_s12, 64  ;;  %p1331_p6 = scmp.lt.s32.totalorder %s1700_s23, %s1329_s12 }
  0x76   : > { %p1326_p4 = pnand %p1324_p2, %p1280_p5  ;;  %p1332_p10 = scmp.lt.s32.totalorder %s1330_s5, %s1323_s20 }
  0x78   : > { %p1327_p9 = pneg %p1326_p4  ;;  %p1333_p12 = por %p1332_p10, %p1331_p6 }
  0x7a   : > { %p1334_p13 = pnand %p1333_p12, %p1327_p9 }
  0x7c   : > { %1337 = shalt.err (!%p1334_p13)
}
  0x7d   : > { %1134 = dma.hbm_to_vmem [thread:$0]  (!%p1659_p0), %s288_s0, 32, %s1700_s23, %s278_s15  }
  0x7e   : > { %p1931_p8 = scmp.ne.s32.totalorder %s1920_s10, 0 }
  0x7f   : > { %s1726_s25 = sand.u32 (!%p1931_p8), 1, %s1452_s24   ;;  %p1932_p5 = scmp.ne.s32.totalorder (!%p1931_p8), %s1917_s8, 0 }
  0x80   : > { %299 = sbr.rel (%p1931_p8) target bundleno = 963 (0x3c3), region = 40  ;;  %s1010_s16 = sshll.u32 (!%p1931_p8), %s1726_s25, 4 }
  0x81   : > { %s302_s21 = scalar_lea.sflag (!%p1931_p8), [#allocation4], %s1726_s25  ;;  %s1732_s22 = scalar_lea.vmem (!%p1931_p8), [#allocation3], %s1010_s16 }
  0x87   : > { %1427 = dma.done.wait (%p1932_p5), %s302_s21, 256  }
  0x88   : > { %1429 = vsyncadd (%p1932_p5), %s302_s21, 4294967040  ;;  %s310_s0 = sand.u32 1, %s1571_s30   ;;  %s1011_s6 = sshll.u32 %s1726_s25, 1 }
  0x89   : > { %s311_s10 = scalar_lea.sflag [#allocation7], %s310_s0  ;;  %s1742_s15 = scalar_lea.vmem [#allocation6], %s1011_s6 }
  0x8a   : > { %1431 = dma.done.wait (%p1932_p5), %s311_s10, 32  }
  0x8b   : > { %1433 = vsyncadd (%p1932_p5), %s311_s10, 4294967264  ;;  %p1933_p0 = scmp.eq.s32.totalorder %s1571_s30, 0 }
  0x8d   : > { %1435 = dma.done.wait (%p1933_p0), [#allocation7], 3072   ;;  %p1934_p3 = pmov %p1933_p0 }
  0x8e   : > { %v1485_v0 = vmov 0.0   ;;  %vm1486_vm0 = vmmov 0   ;;  %v1220_v1 = vld [vmem:[#allocation8 + $0x40] sm:$0xff]   ;;  %v1223_v4 = vld [vmem:[#allocation8 + $0x48] sm:$0xff]   ;;  %v1226_v7 = vld [vmem:[#allocation8 + $0x50] sm:$0xff]   ;;  %v363_v14 = vlaneseq  ;;  %s349_s23 = scalar_lea.vmem [#allocation9], %s1010_s16 }
  0x8f   : > { %1437 = vsyncadd (%p1934_p3), [#allocation7], 4294964224  ;;  %1082 = vmatprep.subr.bf16.mxu1 %v1485_v0  ;;  %1098 = vmatprep.mubr.msk.bf16.mxu1 %vm1486_vm0, %v1485_v0  ;;  %v1221_v2 = vld [vmem:[#allocation8] sm:$0xff]   ;;  %v1224_v5 = vld [vmem:[#allocation8 + $0x8] sm:$0xff]   ;;  %s1041_s7 = sshll.u32 %s1460_s26, 1  ;;  %s1042_s11 = sshll.u32 %s1464_s27, 2 }
  0x90   : > { %1048 = vmatprep.subr.bf16.mxu0 %v1220_v1  ;;  %v1222_v3 = vld [vmem:[#allocation8 + $0x80] sm:$0xff]   ;;  %v1225_v6 = vld [vmem:[#allocation8 + $0x88] sm:$0xff]   ;;  %v1227_v8 = vld [vmem:[#allocation8 + $0x10] sm:$0xff]   ;;  %v1758_v18 = vshrl.u32 %v363_v14, 7  ;;  %s821_s2 = sadd.s32 %s1042_s11, %s1041_s7  ;;  %s824_s18 = sshll.u32 %s349_s23, 4  ;;  %s1807_s18 = int_to_ptr.vmem [resolvable:$true] %s824_s18 }
  0x91   : > { %1049 = vmatpush3.bf16.msra.mxu0 %v1221_v2  ;;  %1083 = vmatpush3.bf16.msra.mxu1 %v1222_v3  ;;  %v1228_v9 = vld [vmem:[#allocation8 + $0x90] sm:$0xff]   ;;  %v1229_v10 = vld [vmem:[#allocation8 + $0x58] sm:$0xff]   ;;  %v1232_v13 = vld [vmem:[#allocation8 + $0x60] sm:$0xff]   ;;  %s1043_s19 = sshll.u32 %s821_s2, 7  ;;  %s1935_s20 = sld [smem:[#allocation25_spill]] }
  0x92   : > { %1050 = vmatprep.subr.bf16.mxu0 %v1223_v4  ;;  %1084 = vmatprep.subr.bf16.mxu1 %v1485_v0  ;;  %v1230_v11 = vld [vmem:[#allocation8 + $0x18] sm:$0xff]   ;;  %v1233_v15 = vld [vmem:[#allocation8 + $0x20] sm:$0xff]   ;;  %v1235_v17 = vld [vmem:[#allocation8 + $0x68] sm:$0xff]   ;;  %vm366_vm1 = vcmp.eq.s32.totalorder %v1758_v18, 0  ;;  %v365_v22 = vadd.s32 8, %v1758_v18  ;;  %v379_v24 = vsub.s32 0, %v1758_v18 }
  0x93   : > { %v1231_v12 = vld [vmem:[#allocation8 + $0x98] sm:$0xff]   ;;  %v1234_v16 = vld [vmem:[#allocation8 + $0xa0] sm:$0xff]   ;;  %v1236_v19 = vld [vmem:[#allocation8 + $0x28] sm:$0xff]   ;;  %v396_v26 = vsub.s32 1, %v1758_v18  ;;  %vm370_vm2 = vcmp.lt.s32.totalorder %v1758_v18, 1  ;;  %vm387_vm4 = vcmp.lt.s32.totalorder %v1758_v18, 7 }
  0x94   : > { %v1237_v20 = vld [vmem:[#allocation8 + $0xa8] sm:$0xff]   ;;  %v1238_v21 = vld [vmem:[#allocation8 + $0x70] sm:$0xff]   ;;  %v1241_v27 = vld [vmem:[#allocation8 + $0x78] sm:$0xff]   ;;  %vm384_vm3 = vcmp.eq.s32.totalorder %v365_v22, 15  ;;  %s804_s12 = scalar_lea.sflag [#allocation5], %s1726_s25  ;;  %s1338_s5 = scalar_lea.vmem %s1807_s18, 256 }
  0x95   : > { %1051 = vmatpush3.bf16.msra.mxu0 %v1224_v5  ;;  %1085 = vmatpush3.bf16.msra.mxu1 %v1225_v6  ;;  %v1239_v23 = vld [vmem:[#allocation8 + $0x30] sm:$0xff]   ;;  %v362_v30 = vld [vmem:[%s1742_s15] sm:$0x3]  ;;  %v1487_v6 = vmov 0.0|0.0   ;;  %p1339_p7 = scmp.ne.s32.totalorder %s1807_s18, %s1338_s5  ;;  %s1488_s16 = smov [#allocation9]  }
  0x96   : > { %1052 = vmatprep.subr.bf16.mxu0 %v1226_v7  ;;  %1086 = vmatprep.subr.bf16.mxu1 %v1485_v0  ;;  %v1240_v25 = vld [vmem:[#allocation8 + $0xb0] sm:$0xff]   ;;  %v380_v36 = vrot.slane %v362_v30, %v379_v24  ;;  %v397_v37 = vrot.slane %v362_v30, %v396_v26  ;;  %v1242_v38 = vld [vmem:[#allocation8 + $0x38] sm:$0xff]   ;;  %s1342_s21 = sshll.u32 %s1488_s16, 4  ;;  %s1343_s21 = int_to_ptr.vmem [resolvable:$false] %s1342_s21 }
  0x97   : > { %v360_v28 = vld [vmem:[%s1732_s22] sm:$0xff]  ;;  %v361_v29 = vld [vmem:[%s1732_s22 + $0x8] sm:$0xff]  ;;  %s1805_s9 = scalar_lea.hbm %s1935_s20, %s1043_s19  ;;  %p1340_p1 = pnand %p1339_p7, %p1631_p11 }
  0x98   : > { %v368_v31 = vrot.slane %v360_v28, 7  ;;  %v369_v32 = vrot.slane %v361_v29, 7  ;;  %v385_v33 = vrot.slane %v360_v28, 1  ;;  %v386_v34 = vrot.slane %v361_v29, 1  ;;  %v1243_v42 = vld [vmem:[#allocation8 + $0xb8] sm:$0xff]   ;;  %s1344_s22 = scalar_lea.vmem %s1343_s21, 512  ;;  %p1345_p4 = scmp.lt.s32.totalorder %s1807_s18, %s1343_s21 }
  0x99   : > { %1053 = vmatpush3.bf16.msra.mxu0 %v1227_v8  ;;  %1087 = vmatpush3.bf16.msra.mxu1 %v1228_v9  ;;  %v401_v35 = vpack.c.bf16 %v361_v29, %v360_v28  ;;  %p1341_p2 = pneg %p1340_p1  ;;  %p1346_p9 = scmp.lt.s32.totalorder %s1344_s22, %s1338_s5 }
  0x9a   : > { %1054 = vmatprep.subr.bf16.mxu0 %v1229_v10  ;;  %1088 = vmatprep.subr.bf16.mxu1 %v1485_v0  ;;  %v371_v39 = vsel %vm370_vm2, %v368_v31, %v369_v32  ;;  %v372_v40 = vsel %vm370_vm2, %v369_v32, %v368_v31  ;;  %v389_v41 = vsel %vm387_vm4, %v386_v34, %v385_v33 }
  0x9b   : > { %v381_v43 = vsel %vm366_vm1, %v380_v36, %v372_v40  ;;  %v388_v44 = vsel %vm387_vm4, %v385_v33, %v386_v34  ;;  %v399_v45 = vsel %vm384_vm3, %v397_v37, %v389_v41  ;;  %627 = vmatprep.mubr.bf16.mxu0 %v401_v35  ;;  %p1347_p6 = por %p1346_p9, %p1345_p4 }
  0x9c   : > { %v400_v46 = vpack.c.bf16 %v371_v39, %v381_v43  ;;  %v402_v47 = vpack.c.bf16 %v399_v45, %v388_v44 }
  0x9d   : > { %1055 = vmatpush3.bf16.msra.mxu0 %v1230_v11  ;;  %1089 = vmatpush3.bf16.msra.mxu1 %v1231_v12  ;;  %p1348_p10 = pnand %p1347_p6, %p1341_p2 }
  0x9e   : > { %1056 = vmatprep.subr.bf16.mxu0 %v1232_v13  ;;  %1090 = vmatprep.subr.bf16.mxu1 %v1485_v0  ;;  %v679_v13 = vld [vmem:[%s1897_s3] sm:$0x7] }
  0x9f   : > { %v706_v14 = vrot.slane %v679_v13, %v379_v24 }
  0xa1   : > { %1057 = vmatpush3.bf16.msra.mxu0 %v1233_v15  ;;  %1091 = vmatpush3.bf16.msra.mxu1 %v1234_v16 }
  0xa2   : > { %1058 = vmatprep.subr.bf16.mxu0 %v1235_v17  ;;  %1092 = vmatprep.subr.bf16.mxu1 %v1485_v0  ;;  %v712_v17 = vrot.slane %v679_v13, %v396_v26 }
  0xa5   : > { %1059 = vmatpush3.bf16.msra.mxu0 %v1236_v19  ;;  %1093 = vmatpush3.bf16.msra.mxu1 %v1237_v20 }
  0xa6   : > { %1060 = vmatprep.subr.bf16.mxu0 %v1238_v21  ;;  %1094 = vmatprep.subr.bf16.mxu1 %v1485_v0 }
  0xa9   : > { %1061 = vmatpush3.bf16.msra.mxu0 %v1239_v23  ;;  %1095 = vmatpush3.bf16.msra.mxu1 %v1240_v25 }
  0xaa   : > { %1062 = vmatprep.subr.bf16.mxu0 %v1241_v27  ;;  %1096 = vmatprep.subr.bf16.mxu1 %v1485_v0  ;;  %v719_v27 = vsub.s32 2, %v1758_v18 }
  0xad   : > { %1063 = vmatpush3.bf16.msra.mxu0 %v1242_v38  ;;  %1097 = vmatpush3.bf16.msra.mxu1 %v1243_v42 }
  0xae   : > { %1109 = vmatprep.subr.bf16.mxu0 %v1487_v6 }
  0xb0   : > { %628 = vmatmul.mubr.bf16.vlgmr.msra.gmra.mrb[0].mxu0 %v400_v46  ;;  %1099 = vmatmul.mubr.bf16.vlgmr.msra.gmra.mrb[0].mxu1 %v402_v47 }
  0xb1   : > { %1106 = vmatprep.mubr.msk.f32.mxu0 %vm1486_vm0, %v1485_v0 }
 0x183   : > { %v1064_v48 = vpop.f32.mrb[0].mxu0  ;;  %v670_v49 = vpop.f32.mrb[0].mxu1 }
 0x184   : > { %v1065_v50 = vpop.f32.mrb[1].mxu0  ;;  %v1100_v52 = vpop.f32.mrb[1].mxu1 }
 0x185   : > { %v1066_v51 = vadd.f32 %v1065_v50, %v1064_v48  ;;  %v1067_v53 = vpop.f32.mrb[2].mxu0  ;;  %v673_v54 = vpop.f32.mrb[2].mxu1 }
 0x186   : > { %v1068_v55 = vpop.f32.mrb[3].mxu0  ;;  %v1101_v58 = vpop.f32.mrb[3].mxu1 }
 0x187   : > { %v671_v56 = vadd.f32 %v1066_v51, %v670_v49  ;;  %v1069_v57 = vadd.f32 %v1068_v55, %v1067_v53 }
 0x189   : > { %v674_v59 = vadd.f32 %v1069_v57, %v673_v54  ;;  %v677_v60 = vadd.f32 %v671_v56, %v360_v28  ;;  %v720_v28 = vrot.slane %v679_v13, %v719_v27 }
 0x18b   : > { %680 = vadd.xlane.f32.xlu0 %v677_v60  ;;  %v678_v61 = vadd.f32 %v674_v59, %v361_v29 }
 0x18f   : > { %682 = vadd.xlane.f32.xlu0 %v678_v61 }
 0x218   : > { %v681_v62 = vpop.xlane.xlu0 %680 }
 0x219   : > { %v685_v63 = vmul.f32 0.0078125, %v681_v62 }
 0x21b   : > { %v687_v1 = vsub.f32 %v677_v60, %v685_v63 }
 0x21c   : > { %v683_v0 = vpop.xlane.xlu0 %682 }
 0x21d   : > { %v686_v2 = vmul.f32 0.0078125, %v683_v0  ;;  %v689_v3 = vmul.f32 %v687_v1, %v687_v1 }
 0x21f   : > { %v688_v4 = vsub.f32 %v678_v61, %v686_v2  ;;  %691 = vadd.xlane.f32.xlu1 %v689_v3 }
 0x221   : > { %v690_v5 = vmul.f32 %v688_v4, %v688_v4 }
 0x223   : > { %693 = vadd.xlane.f32.xlu1 %v690_v5 }
 0x2ac   : > { %v692_v7 = vpop.xlane.xlu1 %691 }
 0x2ad   : > { %v695_v8 = vmul.f32 0.0078125, %v692_v7 }
 0x2af   : > { %v697_v9 = vadd.f32 1e-05, %v695_v8 }
 0x2b0   : > { %v694_v10 = vpop.xlane.xlu1 %693 }
 0x2b1   : > { %1244 = vrsqrt.f32 %v697_v9  ;;  %v696_v11 = vmul.f32 0.0078125, %v694_v10 }
 0x2b3   : > { %v698_v12 = vadd.f32 1e-05, %v696_v11 }
 0x2b5   : > { %1246 = vrsqrt.f32 %v698_v12 }
 0x2bb   : > { %v1245_v15 = vpop.eup %1244 }
 0x2bc   : > { %v701_v16 = vmul.f32 %v1245_v15, %v687_v1 }
 0x2be   : > { %v707_v19 = vmul.f32 %v706_v14, %v701_v16 }
 0x2bf   : > { %v1247_v20 = vpop.eup %1246 }
 0x2c0   : > { %v702_v21 = vmul.f32 %v1247_v20, %v688_v4  ;;  %v713_v22 = vadd.f32 %v712_v17, %v707_v19 }
 0x2c2   : > { %v708_v23 = vmul.f32 %v706_v14, %v702_v21  ;;  %715 = vst [vmem:[%s349_s23] sm:$0xff] %v713_v22 }
 0x2c4   : > { %v714_v25 = vadd.f32 %v712_v17, %v708_v23 }
 0x2c6   : > { %716 = vst [vmem:[%s349_s23 + $0x8] sm:$0xff] %v714_v25  ;;  %v1110_v24 = vpack.c.bf16 %v714_v25, %v713_v22 }
 0x2c8   : > { %1111 = vmatpush3.bf16.xpose.msra.mxu0 %v1110_v24 }
 0x2cf   : > { %1107 = vmatmul.mubr.f32.vlgmr.msra.gmra.mrb[4].mxu0 %v720_v28 }
 0x2d0   : > { %1351 = shalt.err (!%p1348_p10)
}
 0x2d1   : > { %s1352_s0 = scalar_lea.hbm %s1805_s9, 256  ;;  %s1356_s30 = scalar_lea.hbm %s1935_s20, 1024 }
 0x2d2   : > { %p1353_p12 = scmp.ne.s32.totalorder %s1805_s9, %s1352_s0  ;;  %p1357_p5 = scmp.lt.u32.totalorder %s1805_s9, %s1935_s20 }
 0x2d3   : > { %p1358_p0 = scmp.lt.u32.totalorder %s1356_s30, %s1352_s0  ;;  %p1360_p7 = scmp.lt.u32.totalorder %s1352_s0, %s1805_s9 }
 0x2d4   : > { %p1354_p13 = pnand %p1353_p12, %p1631_p11 }
 0x2d5   : > { %p1359_p3 = por %p1358_p0, %p1357_p5 }
 0x2d6   : > { %p1355_p8 = pneg %p1354_p13 }
 0x2d7   : > { %p1361_p1 = por %p1360_p7, %p1359_p3 }
 0x2d9   : > { %p1362_p2 = pnand %p1361_p1, %p1355_p8 }
 0x2db   : > { %1365 = shalt.err (!%p1362_p2)
}
 0x2dc   : > { %s1489_s7 = smov 128   ;;  %s1490_s11 = smov 8   ;;  %vm799_vm5 = vcmask 1040384   ;;  %vm801_vm6 = vcmask 123904  }
 0x2dd   : > { %1120 = dma.vmem_to_hbm [thread:$0]  (%p1631_p11), %s1807_s18, 256, %s1805_s9, %s804_s12, %s1489_s7, %s1489_s7, %s1490_s11  }
 0x2de   : > { %s791_s2 = sld [smem:[#allocation2]]  ;;  %s1044_s19 = sshll.u32 %s1464_s27, 1 }
 0x2df   : > { %s838_s17 = sadd.s32 %s1460_s26, %s1044_s19  ;;  %s356_s5 = scalar_lea.vmem [#allocation10], %s1011_s6 }
 0x2e0   : > { %s1045_s14 = sshll.u32 %s838_s17, 5  ;;  %s842_s16 = sshll.u32 %s356_s5, 4  ;;  %s1842_s16 = int_to_ptr.vmem [resolvable:$true] %s842_s16 }
 0x2e1   : > { %s1936_s12 = sld [smem:[#allocation26_spill]]  ;;  %s809_s26 = scalar_lea.sflag [#allocation11], %s1726_s25 }
 0x2e2   : > { %s1366_s27 = scalar_lea.vmem %s1842_s16, 32  ;;  %s1491_s6 = smov [#allocation10]  }
 0x2e3   : > { %p1367_p4 = scmp.ne.s32.totalorder %s1842_s16, %s1366_s27  ;;  %s1370_s22 = sshll.u32 %s1491_s6, 4  ;;  %s1371_s22 = int_to_ptr.vmem [resolvable:$false] %s1370_s22 }
 0x2e4   : > { %v792_v18 = vstv %s791_s2  ;;  %s1372_s0 = scalar_lea.vmem %s1371_s22, 64  ;;  %p1373_p10 = scmp.lt.s32.totalorder %s1842_s16, %s1371_s22 }
 0x2e5   : > { %p1368_p9 = pnand %p1367_p4, %p1631_p11  ;;  %p1374_p12 = scmp.lt.s32.totalorder %s1372_s0, %s1366_s27 }
 0x2e7   : > { %s1840_s21 = scalar_lea.hbm %s1936_s12, %s1045_s14  ;;  %p1369_p6 = pneg %p1368_p9 }
 0x2e8   : > { %p1375_p13 = por %p1374_p12, %p1373_p10 }
 0x2ea   : > { %p1376_p8 = pnand %p1375_p13, %p1369_p6 }
 0x3a2   : > { %v787_v26 = vpop.f32.mrb[4].mxu0 }
 0x3a3   : > { %v793_v29 = vadd.f32 %v792_v18, %v787_v26  ;;  %v1108_v30 = vpop.f32.mrb[5].mxu0 }
 0x3a5   : > { %v794_v31 = vmul.f32 1.442695, %v793_v29 }
 0x3a7   : > { %1248 = vpow2.f32 %v794_v31 }
 0x3b1   : > { %v1249_v32 = vpop.eup %1248 }
 0x3b2   : > { %v797_v33 = vrot.slane %v1249_v32, 7 }
 0x3b4   : > { %v800_v34 = vsel %vm799_vm5, %v793_v29, %v797_v33 }
 0x3b5   : > { %802 = vst.msk [vmem:[%s356_s5] sm:$0x3] %vm801_vm6, %v800_v34 }
 0x3b6   : > { %1379 = shalt.err (!%p1376_p8)
}
 0x3b7   : > { %s1380_s25 = scalar_lea.hbm %s1840_s21, 32  ;;  %s1384_s30 = scalar_lea.hbm %s1936_s12, 128 }
 0x3b8   : > { %p1381_p5 = scmp.ne.s32.totalorder %s1840_s21, %s1380_s25  ;;  %p1385_p7 = scmp.lt.u32.totalorder %s1840_s21, %s1936_s12 }
 0x3b9   : > { %p1386_p1 = scmp.lt.u32.totalorder %s1384_s30, %s1380_s25  ;;  %p1388_p4 = scmp.lt.u32.totalorder %s1380_s25, %s1840_s21 }
 0x3ba   : > { %p1382_p0 = pnand %p1381_p5, %p1631_p11 }
 0x3bb   : > { %p1387_p2 = por %p1386_p1, %p1385_p7 }
 0x3bc   : > { %p1383_p3 = pneg %p1382_p0 }
 0x3bd   : > { %p1389_p9 = por %p1388_p4, %p1387_p2 }
 0x3bf   : > { %p1390_p6 = pnand %p1389_p9, %p1383_p3 }
 0x3c1   : > { %1393 = shalt.err (!%p1390_p6)
}
 0x3c2   : > { %1121 = dma.vmem_to_hbm [thread:$0]  (%p1631_p11), %s1842_s16, 32, %s1840_s21, %s809_s26  }
 0x3c3 PF: > { %s1937_s7 = sld [smem:[#allocation17_spill]]  ;;  %s1938_s11 = sld [smem:[#allocation19_spill]] }
 0x3c4   : > { %p1145_p10 = scmp.ge.s32.totalorder %s1476_s29, 2 }
 0x3c9   : > { %s854_s2 = sand.u32 1, %s1937_s7   ;;  %p1939_p12 = scmp.ne.s32.totalorder %s1938_s11, 0 }
 0x3ca   : > { %s855_s19 = scalar_lea.sflag [#allocation5], %s854_s2 }
 0x3cb   : > { %p1136_p13 = pnand %p1145_p10, %p1939_p12 }
 0x3cd   : > { %1439 = dma.done.wait (!%p1136_p13), %s855_s19, 256  }
 0x3ce   : > { %1441 = vsyncadd (!%p1136_p13), %s855_s19, 4294967040  ;;  %s864_s17 = scalar_lea.sflag [#allocation11], %s854_s2 }
 0x3cf   : > { %1443 = dma.done.wait (!%p1136_p13), %s864_s17, 32  }
 0x3d0   : > { %1445 = vsyncadd (!%p1136_p13), %s864_s17, 4294967264  ;;  %s30_s29 = sadd.s32 1, %s1476_s29   ;;  %s1940_s13 = sld [smem:[#allocation18_spill]] }
 0x3d1   : > { %p27_p8 = scmp.ge.s32.totalorder %s30_s29, 6   ;;  %s1941_s25 = sld [smem:[#allocation22_spill]] }
 0x3d2   : > { %s1942_s14 = sld [smem:[#allocation20_spill]]  ;;  %s1943_s5 = sld [smem:[#allocation21_spill]] }
 0x3d3   : > { %s1944_s23 = smov %s1452_s24  ;;  %s1946_s26 = smov %s1468_s28 }
 0x3d4   : > { %s1947_s27 = smov %s1472_s4  ;;  %29 = sbr.rel (!%p27_p8) target bundleno = 17 (0x11), region = 119 }
 0x3d6   : > { %s1945_s24 = smov %s1940_s13 }
 0x3d8   : > { %s1948_s28 = smov %s1942_s14  ;;  %s1949_s4 = smov %s1943_s5 }
 0x3db   :  { %869 = vsyncpa [#allocation4], 1 }
 0x3dc   :  { %871 = vsyncpa [#allocation4 + $0x1], 1 }
 0x3dd   :  { %872 = vsyncpa [#allocation7], 1 }
 0x3de   :  { %874 = vsyncpa [#allocation7 + $0x1], 1 }
 0x3df   :  { %875 = vsyncpa [#allocation5], 1 }
 0x3e0   :  { %877 = vsyncpa [#allocation5 + $0x1], 1 }
 0x3e1   :  { %878 = vsyncpa [#allocation11], 1 }
 0x3e2   :  { %880 = vsyncpa [#allocation11 + $0x1], 1 }

</bundles_post_ra>
